<compile_context>
chip_gen: v7x
topology: tpu7x:2x2x1
jax: 0.10.0
libtpu: 0.0.40
codegen_flags: <defaults>
</compile_context>

<pallas_src>
import math
import jax
import jax.numpy as jnp
from jax import lax
from jax.experimental import pallas as pl
from jax.experimental.pallas import tpu as pltpu

# ---- model hyper-params (small, consistent with the module) ----
B = 2          # batch
S = 8          # max_len / sequence length
D = 32         # d_model
H = 4          # num_heads
HD = D // H    # head_dim
FF = 64        # feedforward_dim
BS = B * S     # flattened tokens
LN_EPS = 1e-5
VW = 3 * D     # lane width of the packed constant tile (96)
NVEC = 8       # number of packed bias / LayerNorm rows


def encoder_layer_kernel(x_ref, wqkv_ref, wo_ref, w1_ref, w2_ref, consts_ref, o_ref):
    x = x_ref[...]                                       # (BS, D) float32

    # One packed constant tile: 8 bias/LN rows + the (H*BS, BS) attention mask.
    consts = consts_ref[...]                             # (NVEC + H*BS, VW)
    bqkv = consts[0:1, :3 * D]                           # (1, 3D)  (Q slice pre-scaled)
    b1   = consts[1:2, :FF]                              # (1, FF)
    bo   = consts[2:3, :D]
    b2   = consts[3:4, :D]
    g1   = consts[4:5, :D]
    be1  = consts[5:6, :D]
    g2   = consts[6:7, :D]
    be2  = consts[7:8, :D]
    mask = consts[NVEC:NVEC + H * BS, :BS]               # (H*BS, BS) block-diag, tiled per head

    # ---- fused QKV projection (Wq/bq already carry the 1/sqrt(HD) scale) ----
    qkv = jnp.dot(x, wqkv_ref[...], preferred_element_type=jnp.float32) + bqkv  # (BS, 3D)

    # ---- per-head scores, stacked along sublanes -> ONE softmax pass ----
    dim_nums = (((1,), (1,)), ((), ()))                  # contract last dims: q @ k^T
    s_tiles = []
    for h in range(H):                                   # H = 4, fully unrolled
        lo = h * HD
        qh = qkv[:, lo:lo + HD]                          # (BS, HD)
        kh = qkv[:, D + lo:D + lo + HD]                  # (BS, HD)
        s_tiles.append(lax.dot_general(qh, kh, dim_nums,
                                       preferred_element_type=jnp.float32))  # (BS, BS)
    s_all = jnp.concatenate(s_tiles, axis=0) + mask      # (H*BS, BS), sublane concat

    m = jnp.max(s_all, axis=-1, keepdims=True)
    e = jnp.exp(s_all - m)
    denom = jnp.sum(e, axis=-1, keepdims=True)
    r = pl.reciprocal(denom, approx=True)                # EUP slot
    r = r * (2.0 - denom * r)                            # one Newton step -> ~full f32 precision
    p_all = e * r                                        # (H*BS, BS) softmax weights

    # ---- per-head context, then a SINGLE output projection ----
    ctx_tiles = []
    for h in range(H):
        ph = p_all[h * BS:(h + 1) * BS, :]               # (BS, BS), 8-aligned sublane slice
        vh = qkv[:, 2 * D + h * HD:2 * D + (h + 1) * HD]  # (BS, HD)
        ctx_tiles.append(jnp.dot(ph, vh, preferred_element_type=jnp.float32))  # (BS, HD)
    ctx = jnp.concatenate(ctx_tiles, axis=1)             # (BS, D) within one 128-lane group
    attn = jnp.dot(ctx, wo_ref[...], preferred_element_type=jnp.float32) + bo

    # ---- residual + LayerNorm 1 (var = E[x^2] - mu^2, two independent reduces) ----
    h1 = x + attn
    mu1 = jnp.mean(h1, axis=-1, keepdims=True)
    msq1 = jnp.mean(h1 * h1, axis=-1, keepdims=True)
    var1 = msq1 - mu1 * mu1
    h1n = (h1 - mu1) * lax.rsqrt(var1 + LN_EPS) * g1 + be1

    # ---- feed-forward: Linear -> ReLU -> Linear ----
    ff = jnp.dot(h1n, w1_ref[...], preferred_element_type=jnp.float32) + b1
    ff = jnp.maximum(ff, 0.0)
    ff = jnp.dot(ff, w2_ref[...], preferred_element_type=jnp.float32) + b2

    # ---- residual + LayerNorm 2 ----
    h2 = h1n + ff
    mu2 = jnp.mean(h2, axis=-1, keepdims=True)
    msq2 = jnp.mean(h2 * h2, axis=-1, keepdims=True)
    var2 = msq2 - mu2 * mu2
    h2n = (h2 - mu2) * lax.rsqrt(var2 + LN_EPS) * g2 + be2

    o_ref[...] = h2n.astype(o_ref.dtype)


def encoder_layer(x, packed):
    """x: (B, S, D) float32. packed: dict from pack_params()."""
    b, s, d = x.shape
    assert (b, s, d) == (B, S, D)
    x2 = x.reshape(b * s, d)                             # flatten batch for 2-D matmuls

    vmem = pl.BlockSpec(memory_space=pltpu.MemorySpace.VMEM)   # full array, resident in VMEM
    out = pl.pallas_call(
        encoder_layer_kernel,
        out_shape=jax.ShapeDtypeStruct((b * s, d), jnp.float32),
        in_specs=[vmem, vmem, vmem, vmem, vmem, vmem],
        out_specs=vmem,
    )(x2, packed["wqkv"], packed["wo"], packed["w1"], packed["w2"], packed["consts"])
    return out.reshape(b, s, d)


def init_params(key):
    """Deterministic synthetic parameters (shapes match the nn.Module init).
    Linear weights stored as (in_features, out_features) so y = x @ W + b."""
    ks = jax.random.split(key, 12)

    def lin(kw, kb, fan_in, fan_out):
        bound = 1.0 / math.sqrt(fan_in)
        w = jax.random.uniform(kw, (fan_in, fan_out), jnp.float32, -bound, bound)
        bvec = jax.random.uniform(kb, (1, fan_out), jnp.float32, -bound, bound)
        return w, bvec

    wq, bq = lin(ks[0], ks[1], D, D)
    wk, bk = lin(ks[2], ks[3], D, D)
    wv, bv = lin(ks[4], ks[5], D, D)
    wo, bo = lin(ks[6], ks[7], D, D)
    w1, b1 = lin(ks[8], ks[9], D, FF)
    w2, b2 = lin(ks[10], ks[11], FF, D)

    return dict(
        wq=wq, bq=bq, wk=wk, bk=bk, wv=wv, bv=bv, wo=wo, bo=bo,
        w1=w1, b1=b1, w2=w2, b2=b2,
        g1=jnp.ones((1, D), jnp.float32), be1=jnp.zeros((1, D), jnp.float32),
        g2=jnp.ones((1, D), jnp.float32), be2=jnp.zeros((1, D), jnp.float32),
    )


def pack_params(p):
    """One-time host-side packing: fuse QKV, fold the attention scale into Wq/bq, and pack
    all small vectors plus the precomputed head-tiled block-diagonal mask into ONE tile."""
    inv_sqrt_hd = 1.0 / math.sqrt(HD)
    wq = p["wq"] * inv_sqrt_hd
    bq = p["bq"] * inv_sqrt_hd
    wqkv = jnp.concatenate([wq, p["wk"], p["wv"]], axis=1)          # (D, 3D)
    bqkv = jnp.concatenate([bq, p["bk"], p["bv"]], axis=1)          # (1, 3D)

    def row(vec):
        r = jnp.zeros((1, VW), jnp.float32)
        return r.at[:, :vec.shape[1]].set(vec)

    vec_rows = jnp.concatenate(
        [row(bqkv), row(p["b1"]), row(p["bo"]), row(p["b2"]),
         row(p["g1"]), row(p["be1"]), row(p["g2"]), row(p["be2"])],
        axis=0)                                                     # (NVEC, VW)

    # Block-diagonal additive mask (token i attends only within its own batch element),
    # tiled across heads along sublanes to match the sublane-stacked score layout.
    tok_batch = jnp.arange(BS) // S
    blk = jnp.where(tok_batch[:, None] == tok_batch[None, :],
                    jnp.float32(0.0), jnp.float32(-1e30))           # (BS, BS)
    mask = jnp.tile(blk, (H, 1))                                    # (H*BS, BS)
    mask_rows = jnp.zeros((H * BS, VW), jnp.float32).at[:, :BS].set(mask)

    consts = jnp.concatenate([vec_rows, mask_rows], axis=0)         # (NVEC + H*BS, VW) = (72, 96)
    return dict(wqkv=wqkv, wo=p["wo"], w1=p["w1"], w2=p["w2"], consts=consts)


def encoder_layer_ref(x, p):
    """Pure-JAX reference of the same forward (eval mode, no dropout), using the
    ORIGINAL (unfused, unscaled) parameters — mirrors the PyTorch module."""
    q = x @ p["wq"] + p["bq"]
    k = x @ p["wk"] + p["bk"]
    v = x @ p["wv"] + p["bv"]

    def split(t):  # (B,S,D) -> (B,H,S,HD)
        return t.reshape(B, S, H, HD).transpose(0, 2, 1, 3)

    qh, kh, vh = split(q), split(k), split(v)
    scores = jnp.einsum("bhqd,bhkd->bhqk", qh, kh) / math.sqrt(HD)
    w = jax.nn.softmax(scores, axis=-1)
    ctx = jnp.einsum("bhqk,bhkd->bhqd", w, vh).transpose(0, 2, 1, 3).reshape(B, S, D)
    attn = ctx @ p["wo"] + p["bo"]

    def ln(hh, g, bvec):
        mu = jnp.mean(hh, axis=-1, keepdims=True)
        var = jnp.mean((hh - mu) ** 2, axis=-1, keepdims=True)
        return (hh - mu) * lax.rsqrt(var + LN_EPS) * g + bvec

    h1 = ln(x + attn, p["g1"], p["be1"])
    ff = jnp.maximum(h1 @ p["w1"] + p["b1"], 0.0) @ p["w2"] + p["b2"]
    return ln(h1 + ff, p["g2"], p["be2"])


if __name__ == "__main__":
    key = jax.random.PRNGKey(0)
    kx, kp = jax.random.split(key)
    x = jax.random.normal(kx, (B, S, D), dtype=jnp.float32)
    params = init_params(kp)
    packed = pack_params(params)          # one-time host-side fusion / pre-scaling / mask build

    out = jax.block_until_ready(encoder_layer(x, packed))
    ref = jax.block_until_ready(encoder_layer_ref(x, params))

    assert out.shape == (B, S, D)
    assert jnp.allclose(out, ref, atol=1e-4, rtol=1e-4), "mismatch vs reference"
    print("KERNEL_OK")
</pallas_src>

<mosaic_0001>
module attributes {stable_mosaic.version = 11 : i64} {
  func.func @encoder_layer_kernel(%arg0: memref<16x32xf32, #tpu.memory_space<vmem>>, %arg1: memref<32x96xf32, #tpu.memory_space<vmem>>, %arg2: memref<32x32xf32, #tpu.memory_space<vmem>>, %arg3: memref<32x64xf32, #tpu.memory_space<vmem>>, %arg4: memref<64x32xf32, #tpu.memory_space<vmem>>, %arg5: memref<72x96xf32, #tpu.memory_space<vmem>>, %arg6: memref<16x32xf32, #tpu.memory_space<vmem>>) attributes {dimension_semantics = [], scalar_prefetch = 0 : i64, scratch_operands = 0 : i64, tpu.core_type = #tpu.core_type<tc>} {
    %c0 = arith.constant 0 : index
    %c0_0 = arith.constant 0 : index
    %0 = vector.load %arg0[%c0, %c0_0] : memref<16x32xf32, #tpu.memory_space<vmem>>, vector<16x32xf32>
    %c0_1 = arith.constant 0 : index
    %c0_2 = arith.constant 0 : index
    %1 = vector.load %arg5[%c0_1, %c0_2] : memref<72x96xf32, #tpu.memory_space<vmem>>, vector<72x96xf32>
    %2 = vector.extract_strided_slice %1 {offsets = [0, 0], sizes = [1, 96], strides = [1, 1]} : vector<72x96xf32> to vector<1x96xf32>
    %3 = vector.extract_strided_slice %1 {offsets = [1, 0], sizes = [1, 64], strides = [1, 1]} : vector<72x96xf32> to vector<1x64xf32>
    %4 = vector.extract_strided_slice %1 {offsets = [2, 0], sizes = [1, 32], strides = [1, 1]} : vector<72x96xf32> to vector<1x32xf32>
    %5 = vector.extract_strided_slice %1 {offsets = [3, 0], sizes = [1, 32], strides = [1, 1]} : vector<72x96xf32> to vector<1x32xf32>
    %6 = vector.extract_strided_slice %1 {offsets = [4, 0], sizes = [1, 32], strides = [1, 1]} : vector<72x96xf32> to vector<1x32xf32>
    %7 = vector.extract_strided_slice %1 {offsets = [5, 0], sizes = [1, 32], strides = [1, 1]} : vector<72x96xf32> to vector<1x32xf32>
    %8 = vector.extract_strided_slice %1 {offsets = [6, 0], sizes = [1, 32], strides = [1, 1]} : vector<72x96xf32> to vector<1x32xf32>
    %9 = vector.extract_strided_slice %1 {offsets = [7, 0], sizes = [1, 32], strides = [1, 1]} : vector<72x96xf32> to vector<1x32xf32>
    %10 = vector.extract_strided_slice %1 {offsets = [8, 0], sizes = [64, 16], strides = [1, 1]} : vector<72x96xf32> to vector<64x16xf32>
    %c0_3 = arith.constant 0 : index
    %c0_4 = arith.constant 0 : index
    %11 = vector.load %arg1[%c0_3, %c0_4] : memref<32x96xf32, #tpu.memory_space<vmem>>, vector<32x96xf32>
    %cst = arith.constant dense<0.000000e+00> : vector<16x96xf32>
    %12 = tpu.matmul %0, %11, %cst {dimension_numbers = #tpu.dot_dimension_numbers<[1], [0], [0], [1], [0, 0, 1, 1], [], []>} : vector<16x32xf32>, vector<32x96xf32>, vector<16x96xf32> -> vector<16x96xf32>
    %13 = vector.broadcast %2 : vector<1x96xf32> to vector<16x96xf32>
    %14 = arith.addf %12, %13 : vector<16x96xf32>
    %15 = vector.extract_strided_slice %14 {offsets = [0, 0], sizes = [16, 8], strides = [1, 1]} : vector<16x96xf32> to vector<16x8xf32>
    %16 = vector.extract_strided_slice %14 {offsets = [0, 32], sizes = [16, 8], strides = [1, 1]} : vector<16x96xf32> to vector<16x8xf32>
    %cst_5 = arith.constant dense<0.000000e+00> : vector<16x16xf32>
    %17 = tpu.matmul %15, %16, %cst_5 {dimension_numbers = #tpu.dot_dimension_numbers<[1], [1], [0], [0], [0, 0, 1, 0], [], []>} : vector<16x8xf32>, vector<16x8xf32>, vector<16x16xf32> -> vector<16x16xf32>
    %18 = vector.extract_strided_slice %14 {offsets = [0, 8], sizes = [16, 8], strides = [1, 1]} : vector<16x96xf32> to vector<16x8xf32>
    %19 = vector.extract_strided_slice %14 {offsets = [0, 40], sizes = [16, 8], strides = [1, 1]} : vector<16x96xf32> to vector<16x8xf32>
    %cst_6 = arith.constant dense<0.000000e+00> : vector<16x16xf32>
    %20 = tpu.matmul %18, %19, %cst_6 {dimension_numbers = #tpu.dot_dimension_numbers<[1], [1], [0], [0], [0, 0, 1, 0], [], []>} : vector<16x8xf32>, vector<16x8xf32>, vector<16x16xf32> -> vector<16x16xf32>
    %21 = vector.extract_strided_slice %14 {offsets = [0, 16], sizes = [16, 8], strides = [1, 1]} : vector<16x96xf32> to vector<16x8xf32>
    %22 = vector.extract_strided_slice %14 {offsets = [0, 48], sizes = [16, 8], strides = [1, 1]} : vector<16x96xf32> to vector<16x8xf32>
    %cst_7 = arith.constant dense<0.000000e+00> : vector<16x16xf32>
    %23 = tpu.matmul %21, %22, %cst_7 {dimension_numbers = #tpu.dot_dimension_numbers<[1], [1], [0], [0], [0, 0, 1, 0], [], []>} : vector<16x8xf32>, vector<16x8xf32>, vector<16x16xf32> -> vector<16x16xf32>
    %24 = vector.extract_strided_slice %14 {offsets = [0, 24], sizes = [16, 8], strides = [1, 1]} : vector<16x96xf32> to vector<16x8xf32>
    %25 = vector.extract_strided_slice %14 {offsets = [0, 56], sizes = [16, 8], strides = [1, 1]} : vector<16x96xf32> to vector<16x8xf32>
    %cst_8 = arith.constant dense<0.000000e+00> : vector<16x16xf32>
    %26 = tpu.matmul %24, %25, %cst_8 {dimension_numbers = #tpu.dot_dimension_numbers<[1], [1], [0], [0], [0, 0, 1, 0], [], []>} : vector<16x8xf32>, vector<16x8xf32>, vector<16x16xf32> -> vector<16x16xf32>
    %27 = tpu.concatenate %17, %20, %23, %26 in 0 : vector<16x16xf32>, vector<16x16xf32>, vector<16x16xf32>, vector<16x16xf32> -> vector<64x16xf32>
    %28 = arith.addf %27, %10 : vector<64x16xf32>
    %cst_9 = arith.constant dense<0xFF800000> : vector<64xf32>
    %29 = vector.multi_reduction <maximumf>, %28, %cst_9 [1] : vector<64x16xf32> to vector<64xf32>
    %30 = vector.shape_cast %29 : vector<64xf32> to vector<64x1xf32>
    %31 = vector.broadcast %30 : vector<64x1xf32> to vector<64x16xf32>
    %32 = arith.subf %28, %31 : vector<64x16xf32>
    %33 = math.exp %32 : vector<64x16xf32>
    %cst_10 = arith.constant dense<0.000000e+00> : vector<64xf32>
    %34 = vector.multi_reduction <add>, %33, %cst_10 [1] : vector<64x16xf32> to vector<64xf32>
    %35 = vector.shape_cast %34 : vector<64xf32> to vector<64x1xf32>
    %36 = tpu.reciprocal %35 {approx = true} : vector<64x1xf32> -> vector<64x1xf32>
    %37 = arith.mulf %35, %36 : vector<64x1xf32>
    %cst_11 = arith.constant 2.000000e+00 : f32
    %38 = vector.broadcast %cst_11 : f32 to vector<64x1xf32>
    %39 = arith.subf %38, %37 : vector<64x1xf32>
    %40 = arith.mulf %36, %39 : vector<64x1xf32>
    %41 = vector.broadcast %40 : vector<64x1xf32> to vector<64x16xf32>
    %42 = arith.mulf %33, %41 : vector<64x16xf32>
    %43 = vector.extract_strided_slice %42 {offsets = [0, 0], sizes = [16, 16], strides = [1, 1]} : vector<64x16xf32> to vector<16x16xf32>
    %44 = vector.extract_strided_slice %14 {offsets = [0, 64], sizes = [16, 8], strides = [1, 1]} : vector<16x96xf32> to vector<16x8xf32>
    %cst_12 = arith.constant dense<0.000000e+00> : vector<16x8xf32>
    %45 = tpu.matmul %43, %44, %cst_12 {dimension_numbers = #tpu.dot_dimension_numbers<[1], [0], [0], [1], [0, 0, 1, 1], [], []>} : vector<16x16xf32>, vector<16x8xf32>, vector<16x8xf32> -> vector<16x8xf32>
    %46 = vector.extract_strided_slice %42 {offsets = [16, 0], sizes = [16, 16], strides = [1, 1]} : vector<64x16xf32> to vector<16x16xf32>
    %47 = vector.extract_strided_slice %14 {offsets = [0, 72], sizes = [16, 8], strides = [1, 1]} : vector<16x96xf32> to vector<16x8xf32>
    %cst_13 = arith.constant dense<0.000000e+00> : vector<16x8xf32>
    %48 = tpu.matmul %46, %47, %cst_13 {dimension_numbers = #tpu.dot_dimension_numbers<[1], [0], [0], [1], [0, 0, 1, 1], [], []>} : vector<16x16xf32>, vector<16x8xf32>, vector<16x8xf32> -> vector<16x8xf32>
    %49 = vector.extract_strided_slice %42 {offsets = [32, 0], sizes = [16, 16], strides = [1, 1]} : vector<64x16xf32> to vector<16x16xf32>
    %50 = vector.extract_strided_slice %14 {offsets = [0, 80], sizes = [16, 8], strides = [1, 1]} : vector<16x96xf32> to vector<16x8xf32>
    %cst_14 = arith.constant dense<0.000000e+00> : vector<16x8xf32>
    %51 = tpu.matmul %49, %50, %cst_14 {dimension_numbers = #tpu.dot_dimension_numbers<[1], [0], [0], [1], [0, 0, 1, 1], [], []>} : vector<16x16xf32>, vector<16x8xf32>, vector<16x8xf32> -> vector<16x8xf32>
    %52 = vector.extract_strided_slice %42 {offsets = [48, 0], sizes = [16, 16], strides = [1, 1]} : vector<64x16xf32> to vector<16x16xf32>
    %53 = vector.extract_strided_slice %14 {offsets = [0, 88], sizes = [16, 8], strides = [1, 1]} : vector<16x96xf32> to vector<16x8xf32>
    %cst_15 = arith.constant dense<0.000000e+00> : vector<16x8xf32>
    %54 = tpu.matmul %52, %53, %cst_15 {dimension_numbers = #tpu.dot_dimension_numbers<[1], [0], [0], [1], [0, 0, 1, 1], [], []>} : vector<16x16xf32>, vector<16x8xf32>, vector<16x8xf32> -> vector<16x8xf32>
    %55 = tpu.concatenate %45, %48, %51, %54 in 1 : vector<16x8xf32>, vector<16x8xf32>, vector<16x8xf32>, vector<16x8xf32> -> vector<16x32xf32>
    %c0_16 = arith.constant 0 : index
    %c0_17 = arith.constant 0 : index
    %56 = vector.load %arg2[%c0_16, %c0_17] : memref<32x32xf32, #tpu.memory_space<vmem>>, vector<32x32xf32>
    %cst_18 = arith.constant dense<0.000000e+00> : vector<16x32xf32>
    %57 = tpu.matmul %55, %56, %cst_18 {dimension_numbers = #tpu.dot_dimension_numbers<[1], [0], [0], [1], [0, 0, 1, 1], [], []>} : vector<16x32xf32>, vector<32x32xf32>, vector<16x32xf32> -> vector<16x32xf32>
    %58 = vector.broadcast %4 : vector<1x32xf32> to vector<16x32xf32>
    %59 = arith.addf %57, %58 : vector<16x32xf32>
    %60 = arith.addf %0, %59 : vector<16x32xf32>
    %cst_19 = arith.constant dense<0.000000e+00> : vector<16xf32>
    %61 = vector.multi_reduction <add>, %60, %cst_19 [1] : vector<16x32xf32> to vector<16xf32>
    %62 = vector.shape_cast %61 : vector<16xf32> to vector<16x1xf32>
    %cst_20 = arith.constant 3.200000e+01 : f32
    %63 = vector.broadcast %cst_20 : f32 to vector<16x1xf32>
    %64 = arith.divf %62, %63 : vector<16x1xf32>
    %65 = arith.mulf %60, %60 : vector<16x32xf32>
    %cst_21 = arith.constant dense<0.000000e+00> : vector<16xf32>
    %66 = vector.multi_reduction <add>, %65, %cst_21 [1] : vector<16x32xf32> to vector<16xf32>
    %67 = vector.shape_cast %66 : vector<16xf32> to vector<16x1xf32>
    %cst_22 = arith.constant 3.200000e+01 : f32
    %68 = vector.broadcast %cst_22 : f32 to vector<16x1xf32>
    %69 = arith.divf %67, %68 : vector<16x1xf32>
    %70 = arith.mulf %64, %64 : vector<16x1xf32>
    %71 = arith.subf %69, %70 : vector<16x1xf32>
    %72 = vector.broadcast %64 : vector<16x1xf32> to vector<16x32xf32>
    %73 = arith.subf %60, %72 : vector<16x32xf32>
    %cst_23 = arith.constant 9.99999974E-6 : f32
    %74 = vector.broadcast %cst_23 : f32 to vector<16x1xf32>
    %75 = arith.addf %71, %74 : vector<16x1xf32>
    %76 = math.rsqrt %75 : vector<16x1xf32>
    %77 = vector.broadcast %76 : vector<16x1xf32> to vector<16x32xf32>
    %78 = arith.mulf %73, %77 : vector<16x32xf32>
    %79 = vector.broadcast %6 : vector<1x32xf32> to vector<16x32xf32>
    %80 = arith.mulf %78, %79 : vector<16x32xf32>
    %81 = vector.broadcast %7 : vector<1x32xf32> to vector<16x32xf32>
    %82 = arith.addf %80, %81 : vector<16x32xf32>
    %c0_24 = arith.constant 0 : index
    %c0_25 = arith.constant 0 : index
    %83 = vector.load %arg3[%c0_24, %c0_25] : memref<32x64xf32, #tpu.memory_space<vmem>>, vector<32x64xf32>
    %cst_26 = arith.constant dense<0.000000e+00> : vector<16x64xf32>
    %84 = tpu.matmul %82, %83, %cst_26 {dimension_numbers = #tpu.dot_dimension_numbers<[1], [0], [0], [1], [0, 0, 1, 1], [], []>} : vector<16x32xf32>, vector<32x64xf32>, vector<16x64xf32> -> vector<16x64xf32>
    %85 = vector.broadcast %3 : vector<1x64xf32> to vector<16x64xf32>
    %86 = arith.addf %84, %85 : vector<16x64xf32>
    %cst_27 = arith.constant 0.000000e+00 : f32
    %87 = vector.broadcast %cst_27 : f32 to vector<16x64xf32>
    %88 = arith.maximumf %86, %87 : vector<16x64xf32>
    %c0_28 = arith.constant 0 : index
    %c0_29 = arith.constant 0 : index
    %89 = vector.load %arg4[%c0_28, %c0_29] : memref<64x32xf32, #tpu.memory_space<vmem>>, vector<64x32xf32>
    %cst_30 = arith.constant dense<0.000000e+00> : vector<16x32xf32>
    %90 = tpu.matmul %88, %89, %cst_30 {dimension_numbers = #tpu.dot_dimension_numbers<[1], [0], [0], [1], [0, 0, 1, 1], [], []>} : vector<16x64xf32>, vector<64x32xf32>, vector<16x32xf32> -> vector<16x32xf32>
    %91 = vector.broadcast %5 : vector<1x32xf32> to vector<16x32xf32>
    %92 = arith.addf %90, %91 : vector<16x32xf32>
    %93 = arith.addf %82, %92 : vector<16x32xf32>
    %cst_31 = arith.constant dense<0.000000e+00> : vector<16xf32>
    %94 = vector.multi_reduction <add>, %93, %cst_31 [1] : vector<16x32xf32> to vector<16xf32>
    %95 = vector.shape_cast %94 : vector<16xf32> to vector<16x1xf32>
    %cst_32 = arith.constant 3.200000e+01 : f32
    %96 = vector.broadcast %cst_32 : f32 to vector<16x1xf32>
    %97 = arith.divf %95, %96 : vector<16x1xf32>
    %98 = arith.mulf %93, %93 : vector<16x32xf32>
    %cst_33 = arith.constant dense<0.000000e+00> : vector<16xf32>
    %99 = vector.multi_reduction <add>, %98, %cst_33 [1] : vector<16x32xf32> to vector<16xf32>
    %100 = vector.shape_cast %99 : vector<16xf32> to vector<16x1xf32>
    %cst_34 = arith.constant 3.200000e+01 : f32
    %101 = vector.broadcast %cst_34 : f32 to vector<16x1xf32>
    %102 = arith.divf %100, %101 : vector<16x1xf32>
    %103 = arith.mulf %97, %97 : vector<16x1xf32>
    %104 = arith.subf %102, %103 : vector<16x1xf32>
    %105 = vector.broadcast %97 : vector<16x1xf32> to vector<16x32xf32>
    %106 = arith.subf %93, %105 : vector<16x32xf32>
    %cst_35 = arith.constant 9.99999974E-6 : f32
    %107 = vector.broadcast %cst_35 : f32 to vector<16x1xf32>
    %108 = arith.addf %104, %107 : vector<16x1xf32>
    %109 = math.rsqrt %108 : vector<16x1xf32>
    %110 = vector.broadcast %109 : vector<16x1xf32> to vector<16x32xf32>
    %111 = arith.mulf %106, %110 : vector<16x32xf32>
    %112 = vector.broadcast %8 : vector<1x32xf32> to vector<16x32xf32>
    %113 = arith.mulf %111, %112 : vector<16x32xf32>
    %114 = vector.broadcast %9 : vector<1x32xf32> to vector<16x32xf32>
    %115 = arith.addf %113, %114 : vector<16x32xf32>
    %c0_36 = arith.constant 0 : index
    %c0_37 = arith.constant 0 : index
    %116 = vector.load %arg6[%c0_36, %c0_37] : memref<16x32xf32, #tpu.memory_space<vmem>>, vector<16x32xf32>
    tpu.vector_store %arg6[%c0_36, %c0_37], %115 {strides = array<i32>} : memref<16x32xf32, #tpu.memory_space<vmem>>, vector<16x32xf32>,
    return
  }
}

</mosaic_0001>

<bundles_post_ra>
// kernel: tpu_custom_call.1
= control target key start
LH: loop header
LB: loop body
LE: loop exit
PB: predicated region body
PF: predicated region fallthrough
CT: control target
= control target key end

     0   :  { %11 = vsyncpa [#allocation3], 0  ;;  %s2229_s0 = inlined_call_operand.hbm [shape: f32[16,32], index: 0, kind: input, shape index: {}]   ;;  %s2230_s1 = inlined_call_operand.vmem [shape: f32[32,96], index: 1, kind: input, shape index: {}]   ;;  %s2231_s2 = inlined_call_operand.hbm [shape: f32[32,32], index: 2, kind: input, shape index: {}]   ;;  %s2232_s3 = inlined_call_operand.hbm [shape: f32[32,64], index: 3, kind: input, shape index: {}]   ;;  %s2233_s4 = inlined_call_operand.vmem [shape: f32[64,32], index: 4, kind: input, shape index: {}]   ;;  %s2234_s5 = inlined_call_operand.vmem [shape: f32[72,96], index: 5, kind: input, shape index: {}]   ;;  %s2235_s6 = inlined_call_operand.hbm [shape: f32[16,32], index: 6, kind: output, shape index: {}]  }
   0x1   :  { %12 = vsyncpa [#allocation6], 0 }
   0x2   :  { %13 = vsyncpa [#allocation4], 0  ;;  %s1885_s21 = smov [#allocation5]   ;;  %s1886_s23 = smov [#allocation2]  }
   0x3   :  { %s33_s22 = sshll.u32 %s1885_s21, 4  ;;  %s19_s24 = sshll.u32 %s1886_s23, 4  ;;  %s34_s22 = int_to_ptr.vmem [resolvable:$true] %s33_s22  ;;  %s1939_s24 = int_to_ptr.vmem [resolvable:$true] %s19_s24 }
   0x4   :  { %s1791_s27 = scalar_lea.hbm %s2231_s2, 512 }
   0x5   :  { %p1792_p0 = scmp.ne.s32.totalorder %s2231_s2, %s1791_s27  ;;  %p1795_p1 = scmp.lt.u32.totalorder %s1791_s27, %s2231_s2 }
   0x7   :  { %p1797_p2 = pnand %p1795_p1, %p1792_p0 }
   0x9   :  { %1800 = shalt.err (!%p1797_p2)
}
   0xa   :  { %s1801_s8 = scalar_lea.vmem %s34_s22, 512  ;;  %p1806_p4 = scmp.lt.s32.totalorder %s34_s22, %s34_s22 }
   0xb   :  { %p1802_p3 = scmp.ne.s32.totalorder %s34_s22, %s1801_s8  ;;  %p1807_p5 = scmp.lt.s32.totalorder %s1801_s8, %s1801_s8 }
   0xd   :  { %p1808_p6 = por %p1807_p5, %p1806_p4 }
   0xf   :  { %p1809_p7 = pnand %p1808_p6, %p1802_p3 }
  0x11   :  { %1812 = shalt.err (!%p1809_p7)
}
  0x12   :  { %s1887_s9 = smov 128   ;;  %s1888_s10 = smov 8  }
  0x13   :  { %39 = dma.hbm_to_vmem [thread:$0]  %s2231_s2, 512, %s34_s22, [#allocation6], %s1887_s9, %s1887_s9, %s1888_s10  }
  0x14   :  { %s1813_s15 = scalar_lea.hbm %s2229_s0, 256 }
  0x15   :  { %p1814_p8 = scmp.ne.s32.totalorder %s2229_s0, %s1813_s15  ;;  %p1817_p9 = scmp.lt.u32.totalorder %s1813_s15, %s2229_s0 }
  0x17   :  { %p1819_p10 = pnand %p1817_p9, %p1814_p8 }
  0x19   :  { %1822 = shalt.err (!%p1819_p10)
}
  0x1a   :  { %s1823_s20 = scalar_lea.vmem %s1939_s24, 256  ;;  %p1828_p12 = scmp.lt.s32.totalorder %s1939_s24, %s1939_s24 }
  0x1b   :  { %p1824_p11 = scmp.ne.s32.totalorder %s1939_s24, %s1823_s20  ;;  %p1829_p13 = scmp.lt.s32.totalorder %s1823_s20, %s1823_s20 }
  0x1d   :  { %p1830_p0 = por %p1829_p13, %p1828_p12 }
  0x1f   :  { %p1831_p1 = pnand %p1830_p0, %p1824_p11 }
  0x21   :  { %1834 = shalt.err (!%p1831_p1)
}
  0x22   :  { %25 = dma.hbm_to_vmem [thread:$0]  %s2229_s0, 256, %s1939_s24, [#allocation3], %s1887_s9, %s1887_s9, %s1888_s10  }
  0x23   :  { %s1889_s22 = smov [#allocation7]   ;;  %s1835_s27 = scalar_lea.hbm %s2232_s3, 512 }
  0x24   :  { %s45_s23 = sshll.u32 %s1889_s22, 4  ;;  %p1836_p2 = scmp.ne.s32.totalorder %s2232_s3, %s1835_s27  ;;  %s46_s23 = int_to_ptr.vmem [resolvable:$true] %s45_s23 }
  0x25   :  { %p1839_p3 = scmp.lt.u32.totalorder %s1835_s27, %s2232_s3 }
  0x27   :  { %p1841_p4 = pnand %p1839_p3, %p1836_p2 }
  0x29   :  { %1844 = shalt.err (!%p1841_p4)
}
  0x2a   :  { %s1845_s8 = scalar_lea.vmem %s46_s23, 512  ;;  %p1850_p6 = scmp.lt.s32.totalorder %s46_s23, %s46_s23 }
  0x2b   :  { %p1846_p5 = scmp.ne.s32.totalorder %s46_s23, %s1845_s8  ;;  %p1851_p7 = scmp.lt.s32.totalorder %s1845_s8, %s1845_s8 }
  0x2d   :  { %p1852_p8 = por %p1851_p7, %p1850_p6 }
  0x2f   :  { %p1853_p9 = pnand %p1852_p8, %p1846_p5 }
  0x31   :  { %1856 = shalt.err (!%p1853_p9)
}
  0x32   :  { %51 = dma.hbm_to_vmem [thread:$0]  %s2232_s3, 512, %s46_s23, [#allocation6], %s1887_s9, %s1887_s9, %s1888_s10  }
  0x33   :  { %1879 = dma.done.wait [#allocation3], 256  }
  0x34   :  { %1880 = vsyncadd [#allocation3], 4294967040 }
  0x35   :  { %1881 = dma.done.wait [#allocation6], 1024  }
  0x36   :  { %1882 = vsyncadd [#allocation6], 4294966272  ;;  %vm84_vm0 = vcmask 261120   ;;  %v76_v0 = vld [vmem:[%s2230_s1] sm:$0xff]  ;;  %v77_v1 = vld [vmem:[%s2230_s1 + $0x8] sm:$0xff]  ;;  %v80_v8 = vlaneseq  ;;  %vm172_vm1 = vcmask 64512  }
  0x37   :  { %v78_v2 = vld [vmem:[%s2230_s1 + $0x10] sm:$0xff]  ;;  %v1612_v3 = vpack.c.bf16 %v77_v1, %v76_v0  ;;  %v79_v4 = vld [vmem:[%s2230_s1 + $0x18] sm:$0xff]  ;;  %v2003_v5 = vld [vmem:[#allocation2] sm:$0xff]  ;;  %s1890_s19 = smov 80   ;;  %s1891_s20 = smov 96   ;;  %vm537_vm3 = vcmask 130048  }
  0x38   :  { %v1616_v6 = vpack.c.bf16 %v79_v4, %v78_v2  ;;  %1512 = vmatprep.mubr.msk.f32.mxu1 %vm84_vm0, %v2003_v5  ;;  %v2007_v7 = vld [vmem:[#allocation2 + $0x8] sm:$0xff]  ;;  %v2011_v9 = vshrl.u32 %v80_v8, 7  ;;  %v2017_v11 = vld [vmem:[%s2234_s5] sm:$0xff]  ;;  %s1892_s2 = smov 72   ;;  %s1893_s21 = smov 88   ;;  %vm2029_vm2 = vmpackc.low %vm172_vm1, %vm172_vm1  ;;  %vm1026_vm4 = vcmask 195584  }
  0x39   :  { %1613 = vmatprep.subr.bf16.mxu1 %v1612_v3  ;;  %s1894_s22 = smov 120   ;;  %s1895_s23 = smov 112   ;;  %v69_v41 = vld [vmem:[%s2234_s5 + $0x10] sm:$0xff]  ;;  %v71_v45 = vld [vmem:[%s2234_s5 + $0x20] sm:$0xff]  ;;  %v68_v47 = vld [vmem:[%s2234_s5 + $0x8] sm:$0xff]  ;;  %vm1266_vm5 = vcmask 523264  }
  0x3a   :  { %1615 = vmatpush3.bf16.msra.mxu1 %v1612_v3  ;;  %v82_v10 = vsub.s32 0, %v2011_v9  ;;  %s1896_s25 = smov 104   ;;  %v72_v53 = vld [vmem:[%s2234_s5 + $0x28] sm:$0xff]  ;;  %v70_v54 = vld [vmem:[%s2234_s5 + $0x18] sm:$0xff]  ;;  %v73_v61 = vld [vmem:[%s2234_s5 + $0x30] sm:$0xff]  ;;  %s1897_s3 = smov 64  }
  0x3b   :  { %1617 = vmatprep.subr.bf16.mxu1 %v1616_v6  ;;  %v74_v60 = vld [vmem:[%s2234_s5 + $0x38] sm:$0xff]  ;;  %v75_v4 = vld [vmem:[%s2234_s5 + $0x40] sm:$0xff]  ;;  %s1898_s5 = smov 48   ;;  %s1899_s1 = smov 56  }
  0x3c   :  { %v83_v12 = vrot.slane %v2017_v11, %v82_v10  ;;  %s1900_s18 = smov 40  }
  0x3e   :  { %1619 = vmatpush3.bf16.msra.mxu1 %v1616_v6 }
  0x41   :  { %1513 = vmatmul.mubr.msk.f32.vlgmr.msra.gmra.mrb[0].mxu1 %vm84_vm0, %v2007_v7 }
 0x114   :  { %v1514_v13 = vpop.f32.mrb[0].mxu1 }
 0x115   :  { %v163_v14 = vadd.f32 %v1514_v13, %v83_v12  ;;  %v157_v15 = vpop.f32.mrb[1].mxu1 }
 0x116   :  { %v158_v16 = vadd.f32 %v157_v15, %v83_v12 }
 0x118   :  { %1519 = vmatprep.mubr.msk.f32.mxu1 %vm172_vm1, %v158_v16  ;;  %v2021_v17 = vpack.i.bf16 %v163_v14, %v158_v16 }
 0x11a   :  { %1722 = vrot.lane.b32.xlu1 %v2021_v17, %s1890_s19  ;;  %1712 = vrot.lane.b32.xlu0 %v2021_v17, %s1891_s20  ;;  %s1901_s19 = smov 16   ;;  %s1902_s20 = smov 24  }
 0x11e   :  { %1727 = vrot.lane.b32.xlu1 %v2021_v17, %s1892_s2  ;;  %1717 = vrot.lane.b32.xlu0 %v2021_v17, %s1893_s21 }
 0x122   :  { %258 = vrot.lane.b32.xlu1 %v163_v14, %s1894_s22  ;;  %256 = vrot.lane.b32.xlu0 %v158_v16, %s1894_s22 }
 0x126   :  { %349 = vrot.lane.b32.xlu1 %v163_v14, %s1895_s23  ;;  %347 = vrot.lane.b32.xlu0 %v158_v16, %s1895_s23 }
 0x12a   :  { %440 = vrot.lane.b32.xlu1 %v163_v14, %s1896_s25  ;;  %438 = vrot.lane.b32.xlu0 %v158_v16, %s1896_s25 }
 0x18c   :  { %v1723_v18 = vpop.permute.xlu1 %1722  ;;  %v1713_v19 = vpop.permute.xlu0 %1712 }
 0x18d   :  { %v1725_v20 = vunpack.i.h.bf16 %v1723_v18  ;;  %v1724_v21 = vunpack.i.l.bf16 %v1723_v18  ;;  %v1715_v22 = vunpack.i.h.bf16 %v1713_v19  ;;  %v1714_v23 = vunpack.i.l.bf16 %v1713_v19 }
 0x18f   :  { %v1620_v25 = vpack.c.bf16 %v1715_v22, %v1714_v23  ;;  %v1632_v26 = vpack.c.bf16 %v1725_v20, %v1724_v21 }
 0x190   :  { %v1728_v27 = vpop.permute.xlu1 %1727  ;;  %v1718_v28 = vpop.permute.xlu0 %1717 }
 0x191   :  { %v1730_v29 = vunpack.i.h.bf16 %v1728_v27  ;;  %v1729_v30 = vunpack.i.l.bf16 %v1728_v27  ;;  %v1720_v31 = vunpack.i.h.bf16 %v1718_v28  ;;  %v1719_v32 = vunpack.i.l.bf16 %v1718_v28  ;;  %1622 = vmatprep.subr.msk.bf16.mxu1 %vm2029_vm2, %v1620_v25 }
 0x192   :  { %1625 = vmatpush3.bf16.xpose.msk.msra.mxu1 %vm2029_vm2, %v1620_v25 }
 0x193   :  { %1634 = vmatprep.subr.msk.bf16.mxu1 %vm2029_vm2, %v1632_v26  ;;  %v1626_v33 = vpack.c.bf16 %v1720_v31, %v1719_v32  ;;  %v1638_v35 = vpack.c.bf16 %v1730_v29, %v1729_v30 }
 0x194   :  { %v257_v34 = vpop.permute.xlu0 %256  ;;  %v259_v36 = vpop.permute.xlu1 %258 }
 0x195   :  { %1628 = vmatprep.subr.msk.bf16.mxu0 %vm2029_vm2, %v1626_v33  ;;  %1526 = vmatprep.mubr.msk.f32.mxu0 %vm172_vm1, %v257_v34 }
 0x196   :  { %1631 = vmatpush3.bf16.xpose.msk.msra.mxu0 %vm2029_vm2, %v1626_v33 }
 0x197   :  { %1640 = vmatprep.subr.msk.bf16.mxu0 %vm2029_vm2, %v1638_v35 }
 0x198   :  { %v348_v37 = vpop.permute.xlu0 %347  ;;  %v350_v39 = vpop.permute.xlu1 %349 }
 0x199   :  { %1520 = vmatmul.mubr.msk.f32.vlgmr.msra.gmra.mrb[2].mxu1 %vm172_vm1, %v163_v14 }
 0x19a   :  { %1637 = vmatpush3.bf16.xpose.msk.msra.mxu1 %vm2029_vm2, %v1632_v26  ;;  %1533 = vmatprep.mubr.msk.f32.mxu1 %vm172_vm1, %v348_v37 }
 0x19c   :  { %v439_v38 = vpop.permute.xlu0 %438  ;;  %v441_v40 = vpop.permute.xlu1 %440 }
 0x19d   :  { %1527 = vmatmul.mubr.msk.f32.vlgmr.msra.gmra.mrb[0].mxu0 %vm172_vm1, %v259_v36 }
 0x19e   :  { %1643 = vmatpush3.bf16.xpose.msk.msra.mxu0 %vm2029_vm2, %v1638_v35  ;;  %1540 = vmatprep.mubr.msk.f32.mxu0 %vm172_vm1, %v439_v38 }
 0x1a1   :  { %1534 = vmatmul.mubr.msk.f32.vlgmr.msra.gmra.mrb[4].mxu1 %vm172_vm1, %v350_v39 }
 0x1a5   :  { %1541 = vmatmul.mubr.msk.f32.vlgmr.msra.gmra.mrb[2].mxu0 %vm172_vm1, %v441_v40 }
 0x26c   :  { %v1521_v42 = vpop.f32.mrb[2].mxu1 }
 0x26d   :  { %v530_v43 = vadd.f32 %v1521_v42, %v69_v41  ;;  %v247_v44 = vpop.f32.mrb[3].mxu1 }
 0x26e   :  { %v529_v51 = vadd.f32 %v247_v44, %v68_v47 }
 0x26f   :  { %v541_v46 = vsel %vm537_vm3, %v530_v43, -inf }
 0x270   :  { %v1528_v48 = vpop.f32.mrb[0].mxu0  ;;  %542 = vmax.xlane.f32.xlu1 %v541_v46  ;;  %v538_v59 = vsel %vm537_vm3, %v529_v51, -inf }
 0x271   :  { %v532_v49 = vadd.f32 %v1528_v48, %v71_v45  ;;  %v338_v50 = vpop.f32.mrb[1].mxu0 }
 0x272   :  { %v531_v58 = vadd.f32 %v338_v50, %v70_v54 }
 0x273   :  { %v547_v52 = vsel %vm537_vm3, %v532_v49, -inf }
 0x274   :  { %548 = vmax.xlane.f32.xlu0 %v547_v52  ;;  %v1535_v55 = vpop.f32.mrb[4].mxu1  ;;  %v544_v3 = vsel %vm537_vm3, %v531_v58, -inf }
 0x275   :  { %v429_v56 = vpop.f32.mrb[5].mxu1  ;;  %v534_v2 = vadd.f32 %v1535_v55, %v73_v61 }
 0x276   :  { %v2073_v57 = vadd.f32 %v429_v56, %v72_v53 }
 0x277   :  { %v553_v10 = vsel %vm537_vm3, %v534_v2, -inf }
 0x278   :  { %v1542_v62 = vpop.f32.mrb[2].mxu0  ;;  %539 = vmax.xlane.f32.xlu0 %v538_v59  ;;  %v550_v63 = vsel %vm537_vm3, %v2073_v57, -inf }
 0x279   :  { %v520_v0 = vpop.f32.mrb[3].mxu0  ;;  %551 = vmax.xlane.f32.xlu1 %v550_v63  ;;  %v536_v8 = vadd.f32 %v1542_v62, %v75_v4 }
 0x27a   :  { %v2084_v1 = vadd.f32 %v520_v0, %v74_v60 }
 0x27b   :  { %v559_v12 = vsel %vm537_vm3, %v536_v8, -inf }
 0x27c   :  { %545 = vmax.xlane.f32.xlu0 %v544_v3  ;;  %v556_v6 = vsel %vm537_vm3, %v2084_v1, -inf }
 0x27d   :  { %557 = vmax.xlane.f32.xlu1 %v556_v6 }
 0x280   :  { %554 = vmax.xlane.f32.xlu0 %v553_v10 }
 0x284   :  { %560 = vmax.xlane.f32.xlu0 %v559_v12 }
 0x28e   :  { %1732 = vrot.lane.b32.xlu1 %v2021_v17, %s1897_s3 }
 0x2fd   :  { %v543_v13 = vpop.xlane.xlu1 %542 }
 0x2fe   :  { %v563_v14 = vsub.f32 %v530_v43, %v543_v13 }
 0x300   :  { %v572_v15 = vmul.f32 1.442695, %v563_v14 }
 0x301   :  { %v549_v16 = vpop.xlane.xlu0 %548 }
 0x302   :  { %1751 = vpow2.f32 %v572_v15  ;;  %v565_v18 = vsub.f32 %v532_v49, %v549_v16 }
 0x304   :  { %v576_v19 = vmul.f32 1.442695, %v565_v18 }
 0x305   :  { %v540_v20 = vpop.xlane.xlu0 %539 }
 0x306   :  { %1753 = vpow2.f32 %v576_v19  ;;  %v562_v21 = vsub.f32 %v529_v51, %v540_v20  ;;  %v552_v22 = vpop.xlane.xlu1 %551 }
 0x307   :  { %v566_v50 = vsub.f32 %v2073_v57, %v552_v22 }
 0x308   :  { %v570_v23 = vmul.f32 1.442695, %v562_v21 }
 0x309   :  { %v546_v24 = vpop.xlane.xlu0 %545  ;;  %v578_v51 = vmul.f32 1.442695, %v566_v50 }
 0x30a   :  { %1755 = vpow2.f32 %v570_v23  ;;  %v564_v25 = vsub.f32 %v531_v58, %v546_v24  ;;  %v558_v26 = vpop.xlane.xlu1 %557 }
 0x30b   :  { %v568_v52 = vsub.f32 %v2084_v1, %v558_v26 }
 0x30c   :  { %v2095_v27 = vpop.eup %1751  ;;  %v574_v28 = vmul.f32 1.442695, %v564_v25 }
 0x30d   :  { %v555_v29 = vpop.xlane.xlu0 %554  ;;  %v589_v30 = vsel %vm537_vm3, %v2095_v27, 0.0  ;;  %v582_v53 = vmul.f32 1.442695, %v568_v52 }
 0x30e   :  { %1757 = vpow2.f32 %v574_v28  ;;  %v567_v31 = vsub.f32 %v534_v2, %v555_v29  ;;  %590 = vadd.xlane.f32.xlu0 %v589_v30  ;;  %v1733_v32 = vpop.permute.xlu1 %1732 }
 0x30f   :  { %v1735_v33 = vunpack.i.h.bf16 %v1733_v32  ;;  %v1734_v34 = vunpack.i.l.bf16 %v1733_v32 }
 0x310   :  { %v2099_v35 = vpop.eup %1753  ;;  %v580_v36 = vmul.f32 1.442695, %v567_v31 }
 0x311   :  { %v1644_v37 = vpack.c.bf16 %v1735_v33, %v1734_v34  ;;  %v561_v38 = vpop.xlane.xlu0 %560  ;;  %v595_v39 = vsel %vm537_vm3, %v2099_v35, 0.0 }
 0x312   :  { %1759 = vpow2.f32 %v580_v36  ;;  %v569_v40 = vsub.f32 %v536_v8, %v561_v38  ;;  %596 = vadd.xlane.f32.xlu0 %v595_v39 }
 0x313   :  { %1645 = vmatprep.subr.bf16.mxu1 %v1644_v37 }
 0x314   :  { %v2103_v41 = vpop.eup %1755  ;;  %v584_v42 = vmul.f32 1.442695, %v569_v40  ;;  %1647 = vmatpush3.bf16.msra.mxu1 %v1644_v37 }
 0x315   :  { %v586_v43 = vsel %vm537_vm3, %v2103_v41, 0.0 }
 0x316   :  { %1761 = vpow2.f32 %v584_v42  ;;  %587 = vadd.xlane.f32.xlu1 %v586_v43 }
 0x317   :  { %1763 = vpow2.f32 %v578_v51 }
 0x318   :  { %v2107_v44 = vpop.eup %1757  ;;  %1765 = vpow2.f32 %v582_v53 }
 0x319   :  { %v592_v45 = vsel %vm537_vm3, %v2107_v44, 0.0 }
 0x31a   :  { %593 = vadd.xlane.f32.xlu1 %v592_v45 }
 0x31c   :  { %v2111_v46 = vpop.eup %1759 }
 0x31d   :  { %v601_v47 = vsel %vm537_vm3, %v2111_v46, 0.0 }
 0x31e   :  { %602 = vadd.xlane.f32.xlu0 %v601_v47 }
 0x320   :  { %v2115_v48 = vpop.eup %1761 }
 0x321   :  { %v607_v49 = vsel %vm537_vm3, %v2115_v48, 0.0  ;;  %v2123_v54 = vpop.eup %1763 }
 0x322   :  { %608 = vadd.xlane.f32.xlu0 %v607_v49  ;;  %v598_v55 = vsel %vm537_vm3, %v2123_v54, 0.0  ;;  %v2127_v56 = vpop.eup %1765 }
 0x323   :  { %v604_v58 = vsel %vm537_vm3, %v2127_v56, 0.0 }
 0x32b   :  { %1742 = vrot.lane.b32.xlu1 %v2021_v17, %s1898_s5 }
 0x338   :  { %1737 = vrot.lane.b32.xlu0 %v2021_v17, %s1899_s1 }
 0x34f   :  { %599 = vadd.xlane.f32.xlu1 %v598_v55 }
 0x353   :  { %605 = vadd.xlane.f32.xlu1 %v604_v58 }
 0x364   :  { %1747 = vrot.lane.b32.xlu1 %v2021_v17, %s1900_s18 }
 0x39b   :  { %v591_v57 = vpop.xlane.xlu0 %590 }
 0x39c   :  { %1767 = vrcp.f32 %v591_v57 }
 0x39f   :  { %v597_v59 = vpop.xlane.xlu0 %596 }
 0x3a0   :  { %1769 = vrcp.f32 %v597_v59 }
 0x3a3   :  { %v588_v60 = vpop.xlane.xlu1 %587 }
 0x3a4   :  { %1771 = vrcp.f32 %v588_v60 }
 0x3a6   :  { %v1768_v61 = vpop.eup %1767 }
 0x3a7   :  { %v594_v62 = vpop.xlane.xlu1 %593  ;;  %v619_v63 = vmul.f32 %v1768_v61, %v591_v57 }
 0x3a8   :  { %1773 = vrcp.f32 %v594_v62 }
 0x3a9   :  { %v627_v8 = vsub.f32 2.0, %v619_v63  ;;  %v1030_v63 = vld [vmem:[#allocation5 + $0x8] sm:$0xff] }
 0x3aa   :  { %v1770_v0 = vpop.eup %1769 }
 0x3ab   :  { %v603_v1 = vpop.xlane.xlu0 %602  ;;  %v1743_v2 = vpop.permute.xlu1 %1742  ;;  %v621_v10 = vmul.f32 %v1770_v0, %v597_v59  ;;  %v635_v16 = vmul.f32 %v1768_v61, %v627_v8 }
 0x3ac   :  { %v1745_v3 = vunpack.i.h.bf16 %v1743_v2  ;;  %v1744_v4 = vunpack.i.l.bf16 %v1743_v2  ;;  %1775 = vrcp.f32 %v603_v1 }
 0x3ad   :  { %v629_v18 = vsub.f32 2.0, %v621_v10  ;;  %v643_v26 = vmul.f32 %v2095_v27, %v635_v16 }
 0x3ae   :  { %v1772_v6 = vpop.eup %1771  ;;  %v1652_v12 = vpack.c.bf16 %v1745_v3, %v1744_v4  ;;  %v1032_v3 = vld [vmem:[#allocation5 + $0x18] sm:$0xff] }
 0x3af   :  { %v618_v17 = vmul.f32 %v1772_v6, %v588_v60  ;;  %v609_v13 = vpop.xlane.xlu0 %608  ;;  %v637_v28 = vmul.f32 %v1770_v0, %v629_v18 }
 0x3b0   :  { %1653 = vmatprep.subr.bf16.mxu0 %v1652_v12  ;;  %1777 = vrcp.f32 %v609_v13 }
 0x3b1   :  { %v626_v14 = vsub.f32 2.0, %v618_v17  ;;  %1655 = vmatpush3.bf16.msra.mxu0 %v1652_v12  ;;  %v645_v32 = vmul.f32 %v2099_v35, %v637_v28 }
 0x3b2   :  { %v1774_v15 = vpop.eup %1773 }
 0x3b3   :  { %v634_v19 = vmul.f32 %v1772_v6, %v626_v14  ;;  %v620_v20 = vmul.f32 %v1774_v15, %v594_v62  ;;  %v1738_v21 = vpop.permute.xlu0 %1737  ;;  %v1029_v62 = vld [vmem:[#allocation5] sm:$0xff] }
 0x3b4   :  { %v1740_v22 = vunpack.i.h.bf16 %v1738_v21  ;;  %v1739_v23 = vunpack.i.l.bf16 %v1738_v21 }
 0x3b5   :  { %v642_v24 = vmul.f32 %v2103_v41, %v634_v19  ;;  %v628_v25 = vsub.f32 2.0, %v620_v20 }
 0x3b6   :  { %v1648_v29 = vpack.c.bf16 %v1740_v22, %v1739_v23  ;;  %v1776_v33 = vpop.eup %1775 }
 0x3b7   :  { %v636_v30 = vmul.f32 %v1774_v15, %v628_v25  ;;  %1547 = vmatprep.mubr.msk.f32.mxu1 %vm537_vm3, %v642_v24  ;;  %v623_v36 = vmul.f32 %v1776_v33, %v603_v1  ;;  %v1035_v24 = vsub.s32 2, %v2011_v9 }
 0x3b8   :  { %1548 = vmatmul.mubr.msk.f32.vlgmr.msra.gmra.mrb[6].mxu1 %vm537_vm3, %v643_v26  ;;  %1649 = vmatprep.subr.bf16.mxu1 %v1648_v29 }
 0x3b9   :  { %v644_v31 = vmul.f32 %v2107_v44, %v636_v30  ;;  %1651 = vmatpush3.bf16.msra.mxu1 %v1648_v29  ;;  %v631_v42 = vsub.f32 2.0, %v623_v36  ;;  %v1036_v25 = vrot.slane %v2017_v11, %v1035_v24 }
 0x3ba   :  { %v1778_v37 = vpop.eup %1777 }
 0x3bb   :  { %1554 = vmatprep.mubr.msk.f32.mxu1 %vm537_vm3, %v644_v31  ;;  %v625_v43 = vmul.f32 %v1778_v37, %v609_v13  ;;  %v639_v49 = vmul.f32 %v1776_v33, %v631_v42 }
 0x3bc   :  { %1555 = vmatmul.mubr.msk.f32.vlgmr.msra.gmra.mrb[8].mxu1 %vm537_vm3, %v645_v32 }
 0x3bd   :  { %v633_v50 = vsub.f32 2.0, %v625_v43  ;;  %v647_v58 = vmul.f32 %v2111_v46, %v639_v49  ;;  %v1254_v43 = vld [vmem:[%s2233_s4] sm:$0xff] }
 0x3bf   :  { %v641_v57 = vmul.f32 %v1778_v37, %v633_v50  ;;  %v1258_v50 = vld [vmem:[%s2233_s4 + $0x20] sm:$0xff] }
 0x3c1   :  { %v649_v61 = vmul.f32 %v2115_v48, %v641_v57 }
 0x3dc   :  { %v600_v27 = vpop.xlane.xlu1 %599 }
 0x3dd   :  { %1779 = vrcp.f32 %v600_v27 }
 0x3e0   :  { %v606_v34 = vpop.xlane.xlu1 %605 }
 0x3e1   :  { %1781 = vrcp.f32 %v606_v34 }
 0x3e4   :  { %v1748_v38 = vpop.permute.xlu1 %1747 }
 0x3e5   :  { %v1750_v39 = vunpack.i.h.bf16 %v1748_v38  ;;  %v1749_v40 = vunpack.i.l.bf16 %v1748_v38 }
 0x3e7   :  { %v1780_v41 = vpop.eup %1779  ;;  %v1656_v35 = vpack.c.bf16 %v1750_v39, %v1749_v40  ;;  %v1164_v39 = vld [vmem:[#allocation7 + $0x8] sm:$0xff]  ;;  %v1165_v40 = vld [vmem:[#allocation7 + $0x10] sm:$0xff] }
 0x3e8   :  { %v622_v44 = vmul.f32 %v1780_v41, %v600_v27 }
 0x3e9   :  { %1657 = vmatprep.subr.bf16.mxu1 %v1656_v35 }
 0x3ea   :  { %v630_v45 = vsub.f32 2.0, %v622_v44  ;;  %1659 = vmatpush3.bf16.msra.mxu1 %v1656_v35  ;;  %v1255_v35 = vld [vmem:[%s2233_s4 + $0x8] sm:$0xff]  ;;  %v1256_v44 = vld [vmem:[%s2233_s4 + $0x10] sm:$0xff] }
 0x3eb   :  { %v1782_v47 = vpop.eup %1781 }
 0x3ec   :  { %v638_v51 = vmul.f32 %v1780_v41, %v630_v45  ;;  %v624_v52 = vmul.f32 %v1782_v47, %v606_v34  ;;  %v1166_v41 = vld [vmem:[#allocation7 + $0x18] sm:$0xff]  ;;  %v1676_v45 = vpack.c.bf16 %v1255_v35, %v1254_v43 }
 0x3ed   :  { %v1672_v42 = vpack.c.bf16 %v1166_v41, %v1165_v40 }
 0x3ee   :  { %v646_v53 = vmul.f32 %v2123_v54, %v638_v51  ;;  %v632_v55 = vsub.f32 2.0, %v624_v52  ;;  %v1660_v54 = vpack.c.bf16 %v1030_v63, %v1029_v62  ;;  %v1259_v51 = vld [vmem:[%s2233_s4 + $0x28] sm:$0xff] }
 0x3ef   :  { %v1684_v52 = vpack.c.bf16 %v1259_v51, %v1258_v50 }
 0x3f0   :  { %v640_v59 = vmul.f32 %v1782_v47, %v632_v55  ;;  %1561 = vmatprep.mubr.msk.f32.mxu0 %vm537_vm3, %v646_v53  ;;  %1661 = vmatprep.subr.bf16.mxu0 %v1660_v54  ;;  %v1257_v47 = vld [vmem:[%s2233_s4 + $0x18] sm:$0xff] }
 0x3f1   :  { %1562 = vmatmul.mubr.msk.f32.vlgmr.msra.gmra.mrb[4].mxu0 %vm537_vm3, %v647_v58  ;;  %v1680_v49 = vpack.c.bf16 %v1257_v47, %v1256_v44 }
 0x3f2   :  { %v648_v60 = vmul.f32 %v2127_v56, %v640_v59  ;;  %1663 = vmatpush3.bf16.msra.mxu0 %v1660_v54  ;;  %v1031_v56 = vld [vmem:[#allocation5 + $0x10] sm:$0xff] }
 0x3f3   :  { %v1664_v48 = vpack.c.bf16 %v1032_v3, %v1031_v56  ;;  %v1153_v56 = vsub.s32 4, %v2011_v9  ;;  %v1159_v3 = vsub.s32 5, %v2011_v9 }
 0x3f4   :  { %1568 = vmatprep.mubr.msk.f32.mxu1 %vm537_vm3, %v648_v60 }
 0x3f5   :  { %1569 = vmatmul.mubr.msk.f32.vlgmr.msra.gmra.mrb[10].mxu1 %vm537_vm3, %v649_v61  ;;  %1665 = vmatprep.subr.bf16.mxu0 %v1664_v48 }
 0x3f6   :  { %1667 = vmatpush3.bf16.msra.mxu0 %v1664_v48 }
 0x3f7   :  { %1677 = vmatprep.subr.bf16.mxu0 %v1676_v45 }
 0x48b   :  { %v1549_v46 = vpop.f32.mrb[6].mxu1 }
 0x48c   :  { %v728_v0 = vpop.f32.mrb[7].mxu1 }
 0x48f   :  { %v1556_v1 = vpop.f32.mrb[8].mxu1 }
 0x490   :  { %1002 = vrot.lane.b32.xlu1 %v1556_v1, %s1888_s10  ;;  %v815_v2 = vpop.f32.mrb[9].mxu1 }
 0x491   :  { %1000 = vrot.lane.b32.xlu0 %v815_v2, %s1888_s10 }
 0x4c4   :  { %v1563_v4 = vpop.f32.mrb[4].mxu0 }
 0x4c5   :  { %v902_v6 = vpop.f32.mrb[5].mxu0  ;;  %1010 = vrot.lane.b32.xlu1 %v1563_v4, %s1901_s19  ;;  %v1154_v4 = vrot.slane %v2017_v11, %v1153_v56 }
 0x4c6   :  { %1008 = vrot.lane.b32.xlu0 %v902_v6, %s1901_s19 }
 0x4c8   :  { %v1570_v8 = vpop.f32.mrb[10].mxu1 }
 0x4c9   :  { %1018 = vrot.lane.b32.xlu1 %v1570_v8, %s1902_s20  ;;  %v989_v10 = vpop.f32.mrb[11].mxu1 }
 0x4ca   :  { %1016 = vrot.lane.b32.xlu0 %v989_v10, %s1902_s20  ;;  %v1160_v10 = vrot.slane %v2017_v11, %v1159_v3 }
 0x502   :  { %v1003_v12 = vpop.permute.xlu1 %1002 }
 0x503   :  { %v1001_v17 = vpop.permute.xlu0 %1000  ;;  %v1023_v18 = vsel %vm172_vm1, %v1549_v46, %v1003_v12 }
 0x504   :  { %v1022_v15 = vsel %vm172_vm1, %v728_v0, %v1001_v17 }
 0x537   :  { %v1011_v13 = vpop.permute.xlu1 %1010 }
 0x538   :  { %v1009_v14 = vpop.permute.xlu0 %1008  ;;  %v1025_v21 = vsel %vm537_vm3, %v1023_v18, %v1011_v13 }
 0x539   :  { %v1024_v19 = vsel %vm537_vm3, %v1022_v15, %v1009_v14 }
 0x53b   :  { %v1019_v16 = vpop.permute.xlu1 %1018 }
 0x53c   :  { %v1017_v20 = vpop.permute.xlu0 %1016  ;;  %v1028_v23 = vsel %vm1026_vm4, %v1025_v21, %v1019_v16 }
 0x53d   :  { %v1027_v22 = vsel %vm1026_vm4, %v1024_v19, %v1017_v20  ;;  %v1260_v19 = vld [vmem:[%s2233_s4 + $0x30] sm:$0xff]  ;;  %v1261_v20 = vld [vmem:[%s2233_s4 + $0x38] sm:$0xff]  ;;  %s1903_s4 = smov [#allocation8]  }
 0x53e   :  { %1579 = vmatprep.mubr.msk.f32.mxu0 %vm84_vm0, %v1027_v22  ;;  %v1688_v21 = vpack.c.bf16 %v1261_v20, %v1260_v19  ;;  %v1169_v22 = vsub.s32 1, %v2011_v9  ;;  %s1399_s13 = sshll.u32 %s1903_s4, 4  ;;  %s1400_s13 = int_to_ptr.vmem [resolvable:$true] %s1399_s13 }
 0x53f   :  { %1580 = vmatmul.mubr.msk.f32.vlgmr.msra.gmra.mrb[6].mxu0 %vm84_vm0, %v1028_v23  ;;  %s1857_s14 = scalar_lea.vmem %s1400_s13, 256  ;;  %p1862_p11 = scmp.lt.s32.totalorder %s1400_s13, %s1400_s13 }
 0x540   :  { %1679 = vmatpush3.bf16.msra.mxu0 %v1676_v45  ;;  %v1170_v23 = vrot.slane %v2017_v11, %v1169_v22  ;;  %p1858_p10 = scmp.ne.s32.totalorder %s1400_s13, %s1857_s14  ;;  %p1863_p12 = scmp.lt.s32.totalorder %s1857_s14, %s1857_s14 }
 0x541   :  { %1681 = vmatprep.subr.bf16.mxu0 %v1680_v49 }
 0x542   :  { %p1864_p13 = por %p1863_p12, %p1862_p11 }
 0x544   :  { %1683 = vmatpush3.bf16.msra.mxu0 %v1680_v49  ;;  %p1865_p0 = pnand %p1864_p13, %p1858_p10 }
 0x545   :  { %1685 = vmatprep.subr.bf16.mxu0 %v1684_v52 }
 0x548   :  { %1687 = vmatpush3.bf16.msra.mxu0 %v1684_v52 }
 0x549   :  { %1689 = vmatprep.subr.bf16.mxu0 %v1688_v21 }
 0x54c   :  { %1691 = vmatpush3.bf16.msra.mxu0 %v1688_v21 }
 0x612   :  { %v1581_v26 = vpop.f32.mrb[6].mxu0 }
 0x613   :  { %v1115_v28 = vadd.f32 %v1581_v26, %v1036_v25  ;;  %v1109_v29 = vpop.f32.mrb[7].mxu0 }
 0x614   :  { %v1110_v30 = vadd.f32 %v1109_v29, %v1036_v25 }
 0x615   :  { %v2159_v31 = vadd.f32 %v1115_v28, %v2007_v7  ;;  %v1163_v7 = vld [vmem:[#allocation7] sm:$0xff] }
 0x616   :  { %v1118_v32 = vadd.f32 %v1110_v30, %v2003_v5  ;;  %v1668_v5 = vpack.c.bf16 %v1164_v39, %v1163_v7 }
 0x617   :  { %v1123_v27 = vsel %vm84_vm0, %v2159_v31, 0.0  ;;  %v1130_v37 = vmul.f32 %v2159_v31, %v2159_v31 }
 0x618   :  { %1124 = vadd.xlane.f32.xlu1 %v1123_v27  ;;  %v1120_v33 = vsel %vm84_vm0, %v1118_v32, 0.0  ;;  %v1129_v34 = vmul.f32 %v1118_v32, %v1118_v32  ;;  %1669 = vmatprep.subr.bf16.mxu1 %v1668_v5 }
 0x619   :  { %1121 = vadd.xlane.f32.xlu0 %v1120_v33  ;;  %v1134_v38 = vsel %vm84_vm0, %v1130_v37, 0.0  ;;  %1671 = vmatpush3.bf16.msra.mxu1 %v1668_v5 }
 0x61a   :  { %v1131_v36 = vsel %vm84_vm0, %v1129_v34, 0.0  ;;  %1673 = vmatprep.subr.bf16.mxu1 %v1672_v42 }
 0x61d   :  { %1132 = vadd.xlane.f32.xlu0 %v1131_v36  ;;  %1675 = vmatpush3.bf16.msra.mxu1 %v1672_v42 }
 0x621   :  { %1135 = vadd.xlane.f32.xlu0 %v1134_v38 }
 0x6a5   :  { %v1125_v58 = vpop.xlane.xlu1 %1124 }
 0x6a6   :  { %v1122_v53 = vpop.xlane.xlu0 %1121  ;;  %v1128_v59 = vmul.f32 0.03125, %v1125_v58 }
 0x6a7   :  { %v1127_v55 = vmul.f32 0.03125, %v1122_v53 }
 0x6a8   :  { %v1140_v54 = vmul.f32 %v1128_v59, %v1128_v59  ;;  %v1144_v12 = vsub.f32 %v2159_v31, %v1128_v59  ;;  %v1264_v31 = vsub.s32 3, %v2011_v9 }
 0x6a9   :  { %v1139_v60 = vmul.f32 %v1127_v55, %v1127_v55  ;;  %v1143_v48 = vsub.f32 %v1118_v32, %v1127_v55 }
 0x6aa   :  { %v1133_v57 = vpop.xlane.xlu0 %1132  ;;  %v1265_v32 = vrot.slane %v2017_v11, %v1264_v31 }
 0x6ab   :  { %v1137_v61 = vmul.f32 0.03125, %v1133_v57 }
 0x6ad   :  { %v1141_v62 = vsub.f32 %v1137_v61, %v1139_v60  ;;  %v1382_v60 = vsub.s32 6, %v2011_v9  ;;  %v1388_v61 = vsub.s32 7, %v2011_v9 }
 0x6ae   :  { %v1136_v63 = vpop.xlane.xlu0 %1135 }
 0x6af   :  { %v1145_v46 = vadd.f32 1e-05, %v1141_v62  ;;  %v1138_v0 = vmul.f32 0.03125, %v1136_v63  ;;  %v1383_v63 = vrot.slane %v2017_v11, %v1382_v60 }
 0x6b1   :  { %1783 = vrsqrt.f32 %v1145_v46  ;;  %v1142_v1 = vsub.f32 %v1138_v0, %v1140_v54 }
 0x6b3   :  { %v1146_v2 = vadd.f32 1e-05, %v1142_v1 }
 0x6b5   :  { %1785 = vrsqrt.f32 %v1146_v2  ;;  %v1389_v2 = vrot.slane %v2017_v11, %v1388_v61 }
 0x6bb   :  { %v1784_v6 = vpop.eup %1783 }
 0x6bc   :  { %v1149_v8 = vmul.f32 %v1784_v6, %v1143_v48 }
 0x6be   :  { %v1155_v17 = vmul.f32 %v1154_v4, %v1149_v8 }
 0x6bf   :  { %v1786_v13 = vpop.eup %1785 }
 0x6c0   :  { %v1150_v14 = vmul.f32 %v1786_v13, %v1144_v12  ;;  %v1161_v15 = vadd.f32 %v1160_v10, %v1155_v17 }
 0x6c2   :  { %v1156_v16 = vmul.f32 %v1154_v4, %v1150_v14  ;;  %1590 = vmatprep.mubr.msk.f32.mxu1 %vm84_vm0, %v1161_v15 }
 0x6c4   :  { %v1162_v18 = vadd.f32 %v1160_v10, %v1156_v16 }
 0x6c6   :  { %1591 = vmatmul.mubr.msk.f32.vlgmr.msra.gmra.mrb[12].mxu1 %vm84_vm0, %v1162_v18 }
 0x799   :  { %v1592_v24 = vpop.f32.mrb[12].mxu1 }
 0x79a   :  { %v1249_v25 = vadd.f32 %v1592_v24, %v1170_v23  ;;  %v1243_v26 = vpop.f32.mrb[13].mxu1 }
 0x79b   :  { %v1244_v28 = vadd.f32 %v1243_v26, %v1170_v23 }
 0x79c   :  { %v1253_v30 = vmax.f32 %v1249_v25, 0.0 }
 0x79d   :  { %v1252_v29 = vmax.f32 %v1244_v28, 0.0 }
 0x79f   :  { %1609 = vmatprep.mubr.msk.f32.mxu0 %vm1266_vm5, %v1252_v29 }
 0x7a0   :  { %1610 = vmatmul.mubr.msk.f32.vlgmr.msra.gmra.mrb[8].mxu0 %vm1266_vm5, %v1253_v30 }
 0x873   :  { %v1611_v27 = vpop.f32.mrb[8].mxu0 }
 0x874   :  { %v1345_v33 = vadd.f32 %v1611_v27, %v1265_v32  ;;  %v1339_v34 = vpop.f32.mrb[9].mxu0 }
 0x875   :  { %v1340_v36 = vadd.f32 %v1339_v34, %v1265_v32 }
 0x876   :  { %v1349_v37 = vadd.f32 %v1345_v33, %v1162_v18 }
 0x877   :  { %v1348_v38 = vadd.f32 %v1340_v36, %v1161_v15 }
 0x878   :  { %v1353_v7 = vsel %vm84_vm0, %v1349_v37, 0.0  ;;  %v1359_v39 = vmul.f32 %v1349_v37, %v1349_v37 }
 0x879   :  { %1354 = vadd.xlane.f32.xlu0 %v1353_v7  ;;  %v1350_v5 = vsel %vm84_vm0, %v1348_v38, 0.0  ;;  %v1358_v40 = vmul.f32 %v1348_v38, %v1348_v38 }
 0x87a   :  { %1351 = vadd.xlane.f32.xlu1 %v1350_v5  ;;  %v1363_v41 = vsel %vm84_vm0, %v1359_v39, 0.0 }
 0x87b   :  { %v1360_v42 = vsel %vm84_vm0, %v1358_v40, 0.0 }
 0x87d   :  { %1364 = vadd.xlane.f32.xlu0 %v1363_v41 }
 0x87e   :  { %1361 = vadd.xlane.f32.xlu1 %v1360_v42 }
 0x906   :  { %v1355_v43 = vpop.xlane.xlu0 %1354 }
 0x907   :  { %v1357_v35 = vmul.f32 0.03125, %v1355_v43  ;;  %v1352_v44 = vpop.xlane.xlu1 %1351 }
 0x908   :  { %v1356_v45 = vmul.f32 0.03125, %v1352_v44 }
 0x909   :  { %v1369_v49 = vmul.f32 %v1357_v35, %v1357_v35  ;;  %v1373_v62 = vsub.f32 %v1349_v37, %v1357_v35 }
 0x90a   :  { %v1365_v47 = vpop.xlane.xlu0 %1364  ;;  %v1368_v52 = vmul.f32 %v1356_v45, %v1356_v45  ;;  %v1372_v46 = vsub.f32 %v1348_v38, %v1356_v45 }
 0x90b   :  { %v1367_v50 = vmul.f32 0.03125, %v1365_v47  ;;  %v1362_v51 = vpop.xlane.xlu1 %1361 }
 0x90c   :  { %v1366_v53 = vmul.f32 0.03125, %v1362_v51 }
 0x90d   :  { %v1371_v55 = vsub.f32 %v1367_v50, %v1369_v49 }
 0x90e   :  { %v1370_v58 = vsub.f32 %v1366_v53, %v1368_v52 }
 0x90f   :  { %v1375_v57 = vadd.f32 1e-05, %v1371_v55 }
 0x910   :  { %v1374_v59 = vadd.f32 1e-05, %v1370_v58 }
 0x911   :  { %1787 = vrsqrt.f32 %v1375_v57 }
 0x912   :  { %1789 = vrsqrt.f32 %v1374_v59 }
 0x91b   :  { %v1788_v54 = vpop.eup %1787 }
 0x91c   :  { %v1790_v0 = vpop.eup %1789  ;;  %v1379_v1 = vmul.f32 %v1788_v54, %v1373_v62 }
 0x91d   :  { %v1378_v56 = vmul.f32 %v1790_v0, %v1372_v46 }
 0x91e   :  { %v1385_v3 = vmul.f32 %v1383_v63, %v1379_v1 }
 0x91f   :  { %v1384_v48 = vmul.f32 %v1383_v63, %v1378_v56 }
 0x920   :  { %v1391_v4 = vadd.f32 %v1389_v2, %v1385_v3 }
 0x921   :  { %v1390_v6 = vadd.f32 %v1389_v2, %v1384_v48 }
 0x922   :  { %1393 = vst.msk [vmem:[#allocation8 + $0x8] sm:$0xff] %vm84_vm0, %v1391_v4 }
 0x923   :  { %1392 = vst.msk [vmem:[#allocation8] sm:$0xff] %vm84_vm0, %v1390_v6 }
 0x924   :  { %1868 = shalt.err (!%p1865_p0)
}
 0x925   :  { %s1869_s17 = scalar_lea.hbm %s2235_s6, 256 }
 0x926   :  { %p1870_p1 = scmp.ne.s32.totalorder %s2235_s6, %s1869_s17  ;;  %p1873_p2 = scmp.lt.u32.totalorder %s1869_s17, %s2235_s6 }
 0x928   :  { %p1875_p3 = pnand %p1873_p2, %p1870_p1 }
 0x92a   :  { %1878 = shalt.err (!%p1875_p3)
}
 0x92b   :  { %1405 = dma.vmem_to_hbm [thread:$0]  %s1400_s13, 256, %s2235_s6, [#allocation4], %s1887_s9, %s1887_s9, %s1888_s10  }
 0x92c   :  { %1883 = dma.done.wait [#allocation4], 256  }
 0x92d   :  { %1884 = vsyncadd [#allocation4], 4294967040 }
 0x92e   :  { %1409 = vsyncpa [#allocation3], 1 }
 0x92f   :  { %1410 = vsyncpa [#allocation6], 1 }
 0x930   :  { %1411 = vsyncpa [#allocation4], 1 }

</bundles_post_ra>
